<compile_context>
chip_gen: v7x
topology: tpu7x:2x2x1
jax: 0.10.0
libtpu: 0.0.40
codegen_flags: <defaults>
</compile_context>

<pallas_src>
import functools

import jax
import jax.numpy as jnp
import numpy as np
from jax.experimental import pallas as pl
from jax.experimental.pallas import tpu as pltpu


# ----------------------------------------------------------------------------
# Hardware / tiling helpers
# ----------------------------------------------------------------------------
def _vmem_capacity_bytes():
    """Physical VMEM of the current generation; conservative 64 MiB fallback."""
    try:
        cap = getattr(pltpu.get_tpu_info(), "vmem_capacity_bytes", None)
        if cap:
            return int(cap)
    except Exception:
        pass
    return 64 * 2**20  # v7x per-TensorCore VMEM (smallest of the fleet)


def _pick_block_hw(hw, c, itemsize, vmem_cap):
    """Largest lane tile (multiple of 128, divides hw) with a per-block byte
    target scaled to the generation's VMEM capacity."""
    assert hw % 128 == 0
    target = max(128 * c * itemsize, vmem_cap // 12)          # ~10.6 MiB on 128 MiB parts
    max_lanes = max(128, (target // (itemsize * c)) // 128 * 128)
    best, b = 128, 128
    while b <= min(hw, max_lanes):
        if hw % b == 0:
            best = b
        b += 128
    return best


# ----------------------------------------------------------------------------
# Kernels
# ----------------------------------------------------------------------------
def _se_fused_kernel(x_ref, w1_ref, w2_ref, o_ref, *, inv_hw):
    """Grid (N,).  x_ref/o_ref: [1, C, HW] (whole image resident in VMEM).

    One HBM read of x: pooled mean -> relu(s@W1) -> sigmoid(@W2) -> x * gate."""
    xf = x_ref[...].astype(jnp.float32)                        # (1, C, HW)
    s = jnp.sum(xf, axis=-1) * inv_hw                          # squeeze: (1, C)
    z = jnp.maximum(
        jnp.dot(s, w1_ref[...].astype(jnp.float32),
                preferred_element_type=jnp.float32), 0.0)      # (1, Z)
    logits = jnp.dot(z, w2_ref[...].astype(jnp.float32),
                     preferred_element_type=jnp.float32)       # (1, C)
    gate = 1.0 / (1.0 + jnp.exp(-logits))                      # exact sigmoid
    o_ref[...] = (xf * gate[:, :, None]).astype(o_ref.dtype)


def _se_pool_kernel(x_ref, s_ref, acc_ref, *, inv_hw):
    """Grid (N, T).  x_ref: [1, C, BHW]; s_ref: [1, C, 1] pooled mean output.

    Lane-wide (1, C, 128) accumulator: each tile contributes only 128-lane VPU
    adds; the single cross-lane reduce happens in the last-tile finalize."""
    t = pl.program_id(1)

    @pl.when(t == 0)
    def _():
        acc_ref[...] = jnp.zeros_like(acc_ref)

    bhw = x_ref.shape[-1]                                      # multiple of 128

    def body(i, carry):
        off = pl.multiple_of(i * 128, 128)
        acc_ref[...] += x_ref[:, :, pl.ds(off, 128)].astype(jnp.float32)
        return carry

    jax.lax.fori_loop(0, bhw // 128, body, 0)

    @pl.when(t == pl.num_programs(1) - 1)
    def _():
        s_ref[...] = jnp.sum(acc_ref[...], axis=-1, keepdims=True) * inv_hw


def _se_scale_kernel(x_ref, g_ref, o_ref):
    """Grid (N, T).  out = x * gate; gate broadcast over the lane (spatial) dim."""
    o_ref[...] = (x_ref[...].astype(jnp.float32) * g_ref[...]).astype(o_ref.dtype)


# ----------------------------------------------------------------------------
# Wrapper
# ----------------------------------------------------------------------------
def se_block(x_nchw, w1, w2, *, fuse=None, block_hw=None):
    """SEBlock forward.  x_nchw: [N, C, H, W]; w1: [C, Z]; w2: [Z, C].

    Weight layout: w1 = torch_conv1.weight[:, :, 0, 0].T, w2 likewise."""
    N, C, H, W = x_nchw.shape
    HW = H * W
    Z = w1.shape[1]
    itemsize = x_nchw.dtype.itemsize

    cap = _vmem_capacity_bytes()
    slab = C * HW * itemsize                                   # one image in native dtype
    if fuse is None:
        fuse = slab <= cap // 8                                # ~8 MiB v7x / ~16 MiB v5e/v6e

    xr = x_nchw.reshape(N, C, HW)                              # spatial on lanes, free reshape

    if fuse:
        # Single pass: 1 read + 1 write of x, gate never touches HBM.
        vmem_limit = int(min(cap * 3 // 4, max(16 << 20, 6 * slab + (4 << 20))))
        out = pl.pallas_call(
            functools.partial(_se_fused_kernel, inv_hw=1.0 / HW),
            out_shape=jax.ShapeDtypeStruct((N, C, HW), x_nchw.dtype),
            grid=(N,),
            in_specs=[
                pl.BlockSpec((1, C, HW), lambda n: (n, 0, 0)),
                pl.BlockSpec((C, Z), lambda n: (0, 0)),
                pl.BlockSpec((Z, C), lambda n: (0, 0)),
            ],
            out_specs=pl.BlockSpec((1, C, HW), lambda n: (n, 0, 0)),
            compiler_params=pltpu.CompilerParams(
                dimension_semantics=("parallel",),
                vmem_limit_bytes=vmem_limit),
        )(xr, w1, w2)
        return out.reshape(N, C, H, W)

    # ---- streamed fallback for images too large to be VMEM-resident ----------
    HWp = ((HW + 127) // 128) * 128
    if HWp != HW:
        # Zero padding leaves the pooled *sum* untouched; padded lanes are
        # multiplied by the gate and sliced off below.
        xr = jnp.pad(xr, ((0, 0), (0, 0), (0, HWp - HW)))
    if block_hw is None:
        block_hw = _pick_block_hw(HWp, C, itemsize, cap)
    if block_hw % 128 != 0 or HWp % block_hw != 0:
        raise ValueError(f"block_hw={block_hw} must be a multiple of 128 dividing {HWp}")
    T = HWp // block_hw

    block_bytes = C * block_hw * itemsize
    vmem_limit = int(min(cap * 3 // 4, max(16 << 20, 6 * block_bytes + (4 << 20))))

    # phase 1: streamed global average pool -> pooled means [N, C, 1]
    pooled = pl.pallas_call(
        functools.partial(_se_pool_kernel, inv_hw=1.0 / HW),
        out_shape=jax.ShapeDtypeStruct((N, C, 1), jnp.float32),
        grid=(N, T),
        in_specs=[pl.BlockSpec((1, C, block_hw), lambda n, t: (n, 0, t))],
        out_specs=pl.BlockSpec((1, C, 1), lambda n, t: (n, 0, 0)),
        scratch_shapes=[pltpu.VMEM((1, C, 128), jnp.float32)],
        compiler_params=pltpu.CompilerParams(
            dimension_semantics=("parallel", "arbitrary"),
            vmem_limit_bytes=vmem_limit),
    )(xr)

    # excitation MLP: one batched (N,C)@(C,Z) matmul in plain JAX (no M=1 tails)
    s = pooled[:, :, 0]                                        # (N, C) f32
    z = jnp.maximum(s @ w1.astype(jnp.float32), 0.0)           # (N, Z)
    gate = 1.0 / (1.0 + jnp.exp(-(z @ w2.astype(jnp.float32))))  # (N, C), exact sigmoid
    gate = gate[:, :, None]                                    # (N, C, 1)

    # phase 2: channel-wise rescale (lane-dense stores)
    out = pl.pallas_call(
        _se_scale_kernel,
        out_shape=jax.ShapeDtypeStruct((N, C, HWp), x_nchw.dtype),
        grid=(N, T),
        in_specs=[
            pl.BlockSpec((1, C, block_hw), lambda n, t: (n, 0, t)),
            pl.BlockSpec((1, C, 1), lambda n, t: (n, 0, 0)),
        ],
        out_specs=pl.BlockSpec((1, C, block_hw), lambda n, t: (n, 0, t)),
        compiler_params=pltpu.CompilerParams(
            dimension_semantics=("parallel", "parallel"),
            vmem_limit_bytes=vmem_limit),
    )(xr, gate)

    if HWp != HW:
        out = out[:, :, :HW]
    return out.reshape(N, C, H, W)


def reference(x, w1, w2):
    """Pure-JAX reference with identical semantics."""
    s = jnp.mean(x.astype(jnp.float32), axis=(2, 3))           # [N, C]
    z = jnp.maximum(s @ w1, 0.0)                               # [N, Z]
    a = jax.nn.sigmoid(z @ w2)                                 # [N, C]
    return (x.astype(jnp.float32) * a[:, :, None, None]).astype(x.dtype)


if __name__ == "__main__":
    N, C, H, W = 2, 32, 16, 16
    ratio = 4
    Z = C // ratio                                             # squeeze filters

    key = jax.random.PRNGKey(0)
    kx, k1, k2 = jax.random.split(key, 3)
    x = jax.random.normal(kx, (N, C, H, W), jnp.float32)
    w1 = 0.2 * jax.random.normal(k1, (C, Z), jnp.float32)      # 1x1 conv C -> C//ratio
    w2 = 0.2 * jax.random.normal(k2, (Z, C), jnp.float32)      # 1x1 conv C//ratio -> C

    ref = jax.block_until_ready(reference(x, w1, w2))

    # Fused single-pass path (default for images that fit VMEM).
    out_fused = jax.block_until_ready(se_block(x, w1, w2))
    # Streamed fallback path, forced with small tiles to exercise the
    # multi-tile lane-wide accumulator (T = 2).
    out_streamed = jax.block_until_ready(se_block(x, w1, w2, fuse=False, block_hw=128))

    assert out_fused.shape == (N, C, H, W) and out_fused.dtype == jnp.float32
    np.testing.assert_allclose(np.asarray(out_fused), np.asarray(ref),
                               rtol=1e-4, atol=1e-5)
    np.testing.assert_allclose(np.asarray(out_streamed), np.asarray(ref),
                               rtol=1e-4, atol=1e-5)
    print("KERNEL_OK")
</pallas_src>

<mosaic_0001>
module attributes {stable_mosaic.version = 11 : i64} {
  func.func @_se_fused_kernel(%arg0: i32, %arg1: memref<1x32x256xf32, #tpu.memory_space<vmem>>, %arg2: memref<32x8xf32, #tpu.memory_space<vmem>>, %arg3: memref<8x32xf32, #tpu.memory_space<vmem>>, %arg4: memref<1x32x256xf32, #tpu.memory_space<vmem>>) attributes {dimension_semantics = [#tpu.dimension_semantics<parallel>], iteration_bounds = array<i64: 2>, scalar_prefetch = 0 : i64, scratch_operands = 0 : i64, tpu.core_type = #tpu.core_type<tc>, window_params = [{transform_indices = @transform_0, window_bounds = array<i64: 1, 32, 256>}, {pipeline_mode = #tpu.pipeline_mode<synchronous>, transform_indices = @transform_1, window_bounds = array<i64: 32, 8>}, {pipeline_mode = #tpu.pipeline_mode<synchronous>, transform_indices = @transform_2, window_bounds = array<i64: 8, 32>}, {transform_indices = @transform_3, window_bounds = array<i64: 1, 32, 256>}]} {
    %c0 = arith.constant 0 : index
    %c0_0 = arith.constant 0 : index
    %c0_1 = arith.constant 0 : index
    %0 = vector.load %arg1[%c0, %c0_0, %c0_1] : memref<1x32x256xf32, #tpu.memory_space<vmem>>, vector<1x32x256xf32>
    %cst = arith.constant dense<0.000000e+00> : vector<1x32xf32>
    %1 = vector.multi_reduction <add>, %0, %cst [2] : vector<1x32x256xf32> to vector<1x32xf32>
    %cst_2 = arith.constant 3.906250e-03 : f32
    %2 = vector.broadcast %cst_2 : f32 to vector<1x32xf32>
    %3 = arith.mulf %1, %2 : vector<1x32xf32>
    %c0_3 = arith.constant 0 : index
    %c0_4 = arith.constant 0 : index
    %4 = vector.load %arg2[%c0_3, %c0_4] : memref<32x8xf32, #tpu.memory_space<vmem>>, vector<32x8xf32>
    %cst_5 = arith.constant dense<0.000000e+00> : vector<1x8xf32>
    %5 = tpu.matmul %3, %4, %cst_5 {dimension_numbers = #tpu.dot_dimension_numbers<[1], [0], [0], [1], [0, 0, 1, 1], [], []>} : vector<1x32xf32>, vector<32x8xf32>, vector<1x8xf32> -> vector<1x8xf32>
    %cst_6 = arith.constant 0.000000e+00 : f32
    %6 = vector.broadcast %cst_6 : f32 to vector<1x8xf32>
    %7 = arith.maximumf %5, %6 : vector<1x8xf32>
    %c0_7 = arith.constant 0 : index
    %c0_8 = arith.constant 0 : index
    %8 = vector.load %arg3[%c0_7, %c0_8] : memref<8x32xf32, #tpu.memory_space<vmem>>, vector<8x32xf32>
    %cst_9 = arith.constant dense<0.000000e+00> : vector<1x32xf32>
    %9 = tpu.matmul %7, %8, %cst_9 {dimension_numbers = #tpu.dot_dimension_numbers<[1], [0], [0], [1], [0, 0, 1, 1], [], []>} : vector<1x8xf32>, vector<8x32xf32>, vector<1x32xf32> -> vector<1x32xf32>
    %cst_10 = arith.constant 0.000000e+00 : f32
    %10 = vector.broadcast %cst_10 : f32 to vector<1x32xf32>
    %11 = arith.subf %10, %9 : vector<1x32xf32>
    %12 = math.exp %11 : vector<1x32xf32>
    %cst_11 = arith.constant 1.000000e+00 : f32
    %13 = vector.broadcast %cst_11 : f32 to vector<1x32xf32>
    %14 = arith.addf %13, %12 : vector<1x32xf32>
    %cst_12 = arith.constant 1.000000e+00 : f32
    %15 = vector.broadcast %cst_12 : f32 to vector<1x32xf32>
    %16 = arith.divf %15, %14 : vector<1x32xf32>
    %17 = vector.shape_cast %16 : vector<1x32xf32> to vector<1x32x1xf32>
    %18 = vector.broadcast %17 : vector<1x32x1xf32> to vector<1x32x256xf32>
    %19 = arith.mulf %0, %18 : vector<1x32x256xf32>
    %c0_13 = arith.constant 0 : index
    %c0_14 = arith.constant 0 : index
    %c0_15 = arith.constant 0 : index
    %20 = vector.load %arg4[%c0_13, %c0_14, %c0_15] : memref<1x32x256xf32, #tpu.memory_space<vmem>>, vector<1x32x256xf32>
    tpu.vector_store %arg4[%c0_13, %c0_14, %c0_15], %19 {strides = array<i32>} : memref<1x32x256xf32, #tpu.memory_space<vmem>>, vector<1x32x256xf32>,
    return
  }
  func.func @transform_0(%arg0: i32) -> (i32, i32, i32) {
    %c0_i32 = arith.constant 0 : i32
    %c0_i32_0 = arith.constant 0 : i32
    %c0_i32_1 = arith.constant 0 : i32
    return %arg0, %c0_i32, %c0_i32_0 : i32, i32, i32
  }
  func.func @transform_1(%arg0: i32) -> (i32, i32) {
    %c0_i32 = arith.constant 0 : i32
    %c0_i32_0 = arith.constant 0 : i32
    %c0_i32_1 = arith.constant 0 : i32
    return %c0_i32, %c0_i32_0 : i32, i32
  }
  func.func @transform_2(%arg0: i32) -> (i32, i32) {
    %c0_i32 = arith.constant 0 : i32
    %c0_i32_0 = arith.constant 0 : i32
    %c0_i32_1 = arith.constant 0 : i32
    return %c0_i32, %c0_i32_0 : i32, i32
  }
  func.func @transform_3(%arg0: i32) -> (i32, i32, i32) {
    %c0_i32 = arith.constant 0 : i32
    %c0_i32_0 = arith.constant 0 : i32
    %c0_i32_1 = arith.constant 0 : i32
    return %arg0, %c0_i32, %c0_i32_0 : i32, i32, i32
  }
}

</mosaic_0001>

<bundles_post_ra>
// kernel: tpu_custom_call.1
= control target key start
LH: loop header
LB: loop body
LE: loop exit
PB: predicated region body
PF: predicated region fallthrough
CT: control target
= control target key end

     0   :  { %8 = vsyncpa [#allocation3], 0  ;;  %s969_s0 = inlined_call_operand.hbm [shape: f32[2,32,256], index: 0, kind: input, shape index: {}]   ;;  %s970_s1 = inlined_call_operand.vmem [shape: f32[32,8], index: 1, kind: input, shape index: {}]   ;;  %s971_s2 = inlined_call_operand.vmem [shape: f32[8,32], index: 2, kind: input, shape index: {}]   ;;  %s972_s3 = inlined_call_operand.hbm [shape: f32[2,32,256], index: 3, kind: output, shape index: {}]  }
   0x1   :  { %10 = vsyncpa [#allocation3 + $0x1], 0 }
   0x2   :  { %11 = vsyncpa [#allocation4], 0 }
   0x3   :  { %13 = vsyncpa [#allocation4 + $0x1], 0  ;;  %s756_s12 = smov 0   ;;  %s758_s13 = smov 0  }
   0x4   :  { %s760_s14 = smov 0   ;;  %s762_s15 = smov 0  }
   0x5 LB: > { %s777_s16 = sadd.s32 4294967295, %s725_s15   ;;  %s525_s17 = sadd.s32 4294967294, %s725_s15   ;;  %s725_s15 = sphi %s762_s15, %s985_s15   ;;  %s721_s14 = sphi %s760_s14, %s984_s14   ;;  %s717_s13 = sphi %s758_s13, %s983_s13   ;;  %s713_s12 = sphi %s756_s12, %s982_s12  }
   0x6   : > { %s781_s18 = sadd.s32 1, %s725_s15   ;;  %s26_s19 = sadd.s32 1, %s721_s14 }
   0x7   : > { %s23_s20 = ssub.s32 %s725_s15, %s781_s18  ;;  %p33_p0 = scmp.ne.s32.totalorder %s721_s14, %s717_s13 }
   0x8   : > { %p24_p1 = scmp.eq.s32.totalorder %s23_s20, 0  ;;  %p34_p2 = scmp.eq.s32.totalorder %s725_s15, 0 }
   0x9   : > { %p39_p3 = scmp.ne.s32.totalorder %s717_s13, %s713_s12  ;;  %p40_p4 = scmp.eq.s32.totalorder %s777_s16, 0 }
   0xa   : > { %s793_s21 = scalar_select %p24_p1, %s721_s14, %s26_s19  }
   0xb   : > { %p795_p5 = por %p34_p2, %p33_p0  ;;  %p799_p6 = por %p40_p4, %p39_p3 }
   0xc   : > { %p105_p7 = scmp.eq.s32.totalorder %s777_s16, 1  ;;  %p111_p8 = scmp.eq.s32.totalorder %s525_s17, 1 }
   0xd   : > { %p584_p10 = scmp.lt.s32.totalorder %s725_s15, 2  ;;  %s137_s26 = sand.u32 1, %s721_s14  }
   0xe   : > { %p806_p11 = por %p105_p7, %p33_p0  ;;  %p810_p12 = por %p111_p8, %p39_p3 }
   0xf   : > { %s541_s27 = sshll.u32 %s725_s15, 10  ;;  %s528_s28 = sshll.u32 %s137_s26, 6 }
  0x10   : > { %s976_s24 = scalar_select %p806_p11, 1, 0 }
  0x11   : > { %s977_s25 = scalar_select %p810_p12, 1, 0 }
  0x12   : > { %s819_s4 = scalar_lea.hbm %s969_s0, %s541_s27  ;;  %s141_s5 = scalar_lea.vmem [#allocation2], %s528_s28 }
  0x13   : > { %s148_s6 = sshll.u32 %s141_s5, 4  ;;  %p823_p13 = pnand %p584_p10, %p795_p5  ;;  %s827_s6 = int_to_ptr.vmem [resolvable:$true] %s148_s6 }
  0x14   : > { %s829_s8 = scalar_lea.sflag [#allocation3], %s137_s26  ;;  %s629_s9 = scalar_lea.hbm %s819_s4, 1024 }
  0x15   : > { %p630_p0 = scmp.ne.s32.totalorder %s819_s4, %s629_s9  ;;  %p631_p1 = pneg %p823_p13 }
  0x16   : > { %s634_s17 = scalar_lea.hbm %s969_s0, 2048  ;;  %p635_p4 = scmp.lt.u32.totalorder %s819_s4, %s969_s0 }
  0x17   : > { %p632_p2 = pnand %p631_p1, %p630_p0  ;;  %p636_p5 = scmp.lt.u32.totalorder %s634_s17, %s629_s9 }
  0x18   : > { %p638_p8 = scmp.lt.u32.totalorder %s629_s9, %s819_s4 }
  0x19   : > { %p633_p3 = pneg %p632_p2  ;;  %p637_p7 = por %p636_p5, %p635_p4 }
  0x1b   : > { %p639_p10 = por %p638_p8, %p637_p7 }
  0x1d   : > { %p640_p9 = pnand %p639_p10, %p633_p3 }
  0x1f   : > { %643 = shalt.err (!%p640_p9)
}
  0x20   : > { %s644_s22 = scalar_lea.vmem %s827_s6, 1024  ;;  %s727_s26 = smov [#allocation2]  }
  0x21   : > { %p645_p0 = scmp.ne.s32.totalorder %s827_s6, %s644_s22  ;;  %s649_s27 = sshll.u32 %s727_s26, 4  ;;  %s650_s27 = int_to_ptr.vmem [resolvable:$false] %s649_s27 }
  0x22   : > { %s651_s28 = scalar_lea.vmem %s650_s27, 2048  ;;  %p652_p11 = scmp.lt.s32.totalorder %s827_s6, %s650_s27 }
  0x23   : > { %p647_p2 = pnand %p645_p0, %p631_p1  ;;  %p653_p4 = scmp.lt.s32.totalorder %s651_s28, %s644_s22 }
  0x25   : > { %p648_p12 = pneg %p647_p2  ;;  %p654_p5 = por %p653_p4, %p652_p11 }
  0x27   : > { %p655_p7 = pnand %p654_p5, %p648_p12 }
  0x29   : > { %658 = shalt.err (!%p655_p7)
}
  0x2a   : > { %s728_s29 = smov 256   ;;  %s729_s30 = smov 16  }
  0x2b   : > { %579 = dma.hbm_to_vmem [thread:$0]  (!%p823_p13), %s819_s4, 1024, %s827_s6, %s829_s8, %s728_s29, %s728_s29, %s729_s30  }
  0x2c   : > { %p531_p9 = scmp.ge.s32.totalorder %s725_s15, 1  ;;  %p156_p1 = scmp.lt.s32.totalorder %s725_s15, 3 }
  0x2e   : > { %p157_p3 = pnand %p531_p9, %p156_p1 }
  0x2f   : > { %s860_s5 = sand.u32 (!%p157_p3), 1, %s717_s13  }
  0x30   : > { %160 = sbr.rel (%p157_p3) target bundleno = 808 (0x328), region = 32  ;;  %s532_s9 = sshll.u32 (!%p157_p3), %s860_s5, 6 }
  0x31   : > { %s163_s10 = scalar_lea.sflag (!%p157_p3), [#allocation3], %s860_s5  ;;  %s166_s11 = scalar_lea.vmem (!%p157_p3), [#allocation2], %s532_s9 }
  0x37   : > { %704 = dma.done.wait (%p799_p6), %s163_s10, 1024  }
  0x38   : > { %706 = vsyncadd (%p799_p6), %s163_s10, 4294966272  ;;  %v870_v0 = vld [vmem:[%s166_s11] sm:$0xff]  ;;  %v872_v1 = vld [vmem:[%s166_s11 + $0x8] sm:$0xff]  ;;  %v730_v15 = vmov 0.0|0.0   ;;  %vm731_vm0 = vmmov 0   ;;  %v732_v19 = vmov 0.0   ;;  %v221_v20 = vlaneseq }
  0x39   : > { %v874_v2 = vld [vmem:[%s166_s11 + $0x20] sm:$0xff]  ;;  %v197_v3 = vadd.f32 %v872_v1, %v870_v0  ;;  %v878_v4 = vld [vmem:[%s166_s11 + $0x28] sm:$0xff]  ;;  %v880_v5 = vld [vmem:[%s166_s11 + $0x10] sm:$0xff]  ;;  %566 = vmatprep.subr.bf16.mxu0 %v730_v15  ;;  %558 = vmatprep.mubr.msk.f32.mxu0 %vm731_vm0, %v732_v19  ;;  %vm232_vm1 = vcmask 130112   ;;  %vm239_vm2 = vcmask 195712   ;;  %vm246_vm3 = vcmask 261312  }
  0x3a   : > { %v882_v6 = vld [vmem:[%s166_s11 + $0x18] sm:$0xff]  ;;  %v203_v7 = vadd.f32 %v878_v4, %v874_v2  ;;  %v886_v8 = vld [vmem:[%s166_s11 + $0x30] sm:$0xff]  ;;  %v213_v12 = vld [vmem:[%s970_s1] sm:$0xff]  ;;  %561 = vmatprep.subr.mxu1 %v732_v19  ;;  %563 = vmatprep.mubr.msk.f32.mxu1 %vm731_vm0, %v732_v19  ;;  %v222_v21 = vand.u32 127, %v221_v20  ;;  %v224_v22 = vshrl.u32 %v221_v20, 7  ;;  %vm248_vm4 = vcmask 261120  }
  0x3b   : > { %v888_v9 = vld [vmem:[%s166_s11 + $0x38] sm:$0xff]  ;;  %198 = vadd.xlane.f32.xlu0 %v197_v3  ;;  %v200_v10 = vadd.f32 %v882_v6, %v880_v5  ;;  %v214_v13 = vld [vmem:[%s970_s1 + $0x8] sm:$0xff]  ;;  %v215_v16 = vld [vmem:[%s970_s1 + $0x10] sm:$0xff]  ;;  %vm323_vm5 = vcmask 64512   ;;  %s188_s27 = scalar_lea.vmem [#allocation5], %s532_s9  ;;  %s542_s29 = sshll.u32 %s777_s16, 10 }
  0x3c   : > { %204 = vadd.xlane.f32.xlu1 %v203_v7  ;;  %v206_v11 = vadd.f32 %v888_v9, %v886_v8  ;;  %v567_v14 = vpack.c.bf16 %v214_v13, %v213_v12  ;;  %v216_v17 = vld [vmem:[%s970_s1 + $0x18] sm:$0xff]  ;;  %v227_v23 = vadd.s32 4294967288, %v222_v21  ;;  %v234_v25 = vadd.s32 4294967280, %v222_v21  ;;  %v322_v45 = vld [vmem:[%s971_s2] sm:$0xff]  ;;  %s452_s28 = sshll.u32 %s188_s27, 4  ;;  %s923_s10 = scalar_lea.hbm %s972_s3, %s542_s29  ;;  %s918_s28 = int_to_ptr.vmem [resolvable:$true] %s452_s28 }
  0x3d   : > { %v570_v18 = vpack.c.bf16 %v216_v17, %v215_v16  ;;  %v241_v26 = vadd.s32 4294967272, %v222_v21  ;;  %v225_v28 = vsub.s32 %v222_v21, %v224_v22  ;;  %562 = vmatpush3.msra.mxu1 %v322_v45  ;;  %v405_v55 = vsub.s32 0, %v224_v22  ;;  %s439_s16 = scalar_lea.sflag [#allocation4], %s860_s5  ;;  %s659_s11 = scalar_lea.vmem %s918_s28, 1024 }
  0x3e   : > { %568 = vmatpush3.bf16.msra.mxu0 %v567_v14  ;;  %v230_v30 = vsub.s32 %v227_v23, %v224_v22  ;;  %v237_v31 = vsub.s32 %v234_v25, %v224_v22  ;;  %p660_p6 = scmp.ne.s32.totalorder %s918_s28, %s659_s11  ;;  %p979_p11 = scmp.ne.s32.totalorder %s976_s24, 0 }
  0x3f   : > { %201 = vadd.xlane.f32.xlu0 %v200_v10  ;;  %569 = vmatprep.subr.bf16.mxu0 %v730_v15  ;;  %v244_v34 = vsub.s32 %v241_v26, %v224_v22  ;;  %s733_s23 = smov [#allocation5]  }
  0x40   : > { %207 = vadd.xlane.f32.xlu1 %v206_v11  ;;  %p661_p12 = pnand %p660_p6, %p979_p11  ;;  %s663_s4 = sshll.u32 %s733_s23, 4  ;;  %s664_s4 = int_to_ptr.vmem [resolvable:$false] %s663_s4 }
  0x41   : > { %s665_s6 = scalar_lea.vmem %s664_s4, 2048  ;;  %p666_p8 = scmp.lt.s32.totalorder %s918_s28, %s664_s4 }
  0x42   : > { %571 = vmatpush3.bf16.msra.mxu0 %v570_v18  ;;  %p662_p13 = pneg %p661_p12  ;;  %p667_p10 = scmp.lt.s32.totalorder %s665_s6, %s659_s11 }
  0x44   : > { %p668_p0 = por %p667_p10, %p666_p8 }
  0x46   : > { %p669_p2 = pnand %p668_p0, %p662_p13 }
  0xc8   : > { %v199_v24 = vpop.xlane.xlu0 %198 }
  0xc9   : > { %v205_v27 = vpop.xlane.xlu1 %204  ;;  %v209_v29 = vmul.f32 0.00390625, %v199_v24 }
  0xca   : > { %v211_v32 = vmul.f32 0.00390625, %v205_v27 }
  0xcb   : > { %v226_v38 = vrot.slane %v209_v29, %v225_v28 }
  0xcc   : > { %v202_v33 = vpop.xlane.xlu0 %201  ;;  %v238_v40 = vrot.slane %v211_v32, %v237_v31 }
  0xcd   : > { %v210_v35 = vmul.f32 0.00390625, %v202_v33  ;;  %v208_v36 = vpop.xlane.xlu1 %207 }
  0xce   : > { %v212_v37 = vmul.f32 0.00390625, %v208_v36 }
  0xcf   : > { %v231_v39 = vrot.slane %v210_v35, %v230_v30 }
  0xd0   : > { %v245_v41 = vrot.slane %v212_v37, %v244_v34 }
  0xd1   : > { %v233_v42 = vsel %vm232_vm1, %v231_v39, %v226_v38 }
  0xd2   : > { %v240_v43 = vsel %vm239_vm2, %v238_v40, %v233_v42 }
  0xd3   : > { %v247_v44 = vsel %vm246_vm3, %v245_v41, %v240_v43 }
  0xd4   : > { %559 = vmatmul.mubr.msk.f32.vlgmr.msra.gmra.mrb[0].mxu0 %vm248_vm4, %v247_v44 }
 0x1a7   : > { %v317_v46 = vpop.f32.mrb[0].mxu0 }
 0x1a8   : > { %v321_v47 = vmax.f32 %v317_v46, 0.0  ;;  %v560_v48 = vpop.f32.mrb[1].mxu0 }
 0x1aa   : > { %564 = vmatmul.mubr.msk.f32.vlgmr.msra.gmra.mrb[0].mxu1 %vm323_vm5, %v321_v47 }
 0x27d   : > { %v393_v49 = vpop.f32.mrb[0].mxu1 }
 0x27e   : > { %v397_v50 = vsub.f32 0.0, %v393_v49  ;;  %v565_v51 = vpop.f32.mrb[1].mxu1 }
 0x280   : > { %v398_v52 = vmul.f32 1.442695, %v397_v50 }
 0x282   : > { %625 = vpow2.f32 %v398_v52 }
 0x28c   : > { %v626_v53 = vpop.eup %625 }
 0x28d   : > { %v400_v54 = vadd.f32 1.0, %v626_v53 }
 0x28f   : > { %627 = vrcp.f32 %v400_v54 }
 0x299   : > { %v628_v56 = vpop.eup %627 }
 0x29a   : > { %v406_v57 = vrot.slane %v628_v56, %v405_v55 }
 0x29c   : > { %412 = vbcast.lane.b32.xlu1 %v406_v57, 264  ;;  %408 = vbcast.lane.b32.xlu0 %v406_v57, 256 }
 0x2a0   : > { %416 = vbcast.lane.b32.xlu1 %v406_v57, 272 }
 0x2a4   : > { %420 = vbcast.lane.b32.xlu1 %v406_v57, 280 }
 0x30e   : > { %v413_v58 = vpop.permute.xlu1 %412  ;;  %v409_v59 = vpop.permute.xlu0 %408 }
 0x30f   : > { %v424_v60 = vmul.f32 %v413_v58, %v880_v5  ;;  %v425_v61 = vmul.f32 %v413_v58, %v882_v6  ;;  %v422_v62 = vmul.f32 %v409_v59, %v870_v0  ;;  %v423_v63 = vmul.f32 %v409_v59, %v872_v1 }
 0x311   : > { %432 = vst [vmem:[%s188_s27 + $0x10] sm:$0xff] %v424_v60  ;;  %433 = vst [vmem:[%s188_s27 + $0x18] sm:$0xff] %v425_v61 }
 0x312   : > { %430 = vst [vmem:[%s188_s27] sm:$0xff] %v422_v62  ;;  %431 = vst [vmem:[%s188_s27 + $0x8] sm:$0xff] %v423_v63  ;;  %v417_v3 = vpop.permute.xlu1 %416 }
 0x313   : > { %v426_v7 = vmul.f32 %v417_v3, %v874_v2  ;;  %v427_v5 = vmul.f32 %v417_v3, %v878_v4 }
 0x315   : > { %434 = vst [vmem:[%s188_s27 + $0x20] sm:$0xff] %v426_v7  ;;  %435 = vst [vmem:[%s188_s27 + $0x28] sm:$0xff] %v427_v5 }
 0x316   : > { %v421_v0 = vpop.permute.xlu1 %420 }
 0x317   : > { %v428_v1 = vmul.f32 %v421_v0, %v886_v8  ;;  %v429_v2 = vmul.f32 %v421_v0, %v888_v9 }
 0x319   : > { %436 = vst [vmem:[%s188_s27 + $0x30] sm:$0xff] %v428_v1  ;;  %437 = vst [vmem:[%s188_s27 + $0x38] sm:$0xff] %v429_v2 }
 0x31a   : > { %672 = shalt.err (!%p669_p2)
}
 0x31b   : > { %s673_s7 = scalar_lea.hbm %s923_s10, 1024  ;;  %s677_s19 = scalar_lea.hbm %s972_s3, 2048 }
 0x31c   : > { %p674_p4 = scmp.ne.s32.totalorder %s923_s10, %s673_s7  ;;  %p678_p9 = scmp.lt.u32.totalorder %s923_s10, %s972_s3 }
 0x31d   : > { %p679_p1 = scmp.lt.u32.totalorder %s677_s19, %s673_s7  ;;  %p681_p6 = scmp.lt.u32.totalorder %s673_s7, %s923_s10 }
 0x31e   : > { %p675_p5 = pnand %p674_p4, %p979_p11 }
 0x31f   : > { %p680_p3 = por %p679_p1, %p678_p9 }
 0x320   : > { %p676_p7 = pneg %p675_p5 }
 0x321   : > { %p682_p12 = por %p681_p6, %p680_p3 }
 0x323   : > { %p683_p13 = pnand %p682_p12, %p676_p7 }
 0x325   : > { %686 = shalt.err (!%p683_p13)
}
 0x326   : > { %s734_s26 = smov 256   ;;  %s735_s27 = smov 16  }
 0x327   : > { %574 = dma.vmem_to_hbm [thread:$0]  (%p979_p11), %s918_s28, 1024, %s923_s10, %s439_s16, %s734_s26, %s734_s26, %s735_s27  }
 0x328 PF: > { %s467_s29 = sand.u32 1, %s713_s12   ;;  %p980_p8 = scmp.ne.s32.totalorder %s977_s25, 0 }
 0x329   : > { %p981_p10 = scmp.ge.s32.totalorder %s725_s15, 2  ;;  %s468_s30 = scalar_lea.sflag [#allocation4], %s467_s29 }
 0x32b   : > { %p581_p0 = pnand %p981_p10, %p980_p8 }
 0x32d   : > { %708 = dma.done.wait (!%p581_p0), %s468_s30, 1024  }
 0x32e   : > { %710 = vsyncadd (!%p581_p0), %s468_s30, 4294966272  ;;  %p16_p2 = scmp.ge.s32.totalorder %s781_s18, 4   ;;  %s982_s12 = smov %s717_s13 }
 0x32f   : > { %s983_s13 = smov %s721_s14  ;;  %s984_s14 = smov %s793_s21 }
 0x330   : > { %s985_s15 = smov %s781_s18  ;;  %18 = sbr.rel (!%p16_p2) target bundleno = 5 (0x5), region = 77 }
 0x337   :  { %473 = vsyncpa [#allocation3], 1 }
 0x338   :  { %475 = vsyncpa [#allocation3 + $0x1], 1 }
 0x339   :  { %476 = vsyncpa [#allocation4], 1 }
 0x33a   :  { %478 = vsyncpa [#allocation4 + $0x1], 1 }

</bundles_post_ra>
